<compile_context>
chip_gen: v6e
topology: v6e:2x2x1
jax: 0.10.0
libtpu: 0.0.40
codegen_flags: <defaults>
</compile_context>

<pallas_src>
import functools

import jax
import jax.numpy as jnp
import numpy as np
from jax.experimental import pallas as pl
from jax.experimental.pallas import tpu as pltpu


def _upsample_matmul_kernel(x_ref, r_ref, o_ref, *, precision):
    # x_ref: (tm, W)        rows of the flattened (N*C*H, W) input
    # r_ref: (W, n_cols)    one-hot replication matrix (VMEM-resident across the grid)
    # o_ref: (tm, n_cols)   rows of the flattened output
    o_ref[...] = jnp.dot(
        x_ref[...],
        r_ref[...],
        preferred_element_type=jnp.float32,
        precision=precision,
    ).astype(o_ref.dtype)


def _build_replication_matrix(W: int, sh: int, sw: int, dtype) -> jnp.ndarray:
    """R of shape (W, sh*sw*W) with R[w, k*W*sw + j] = 1 iff j // sw == w."""
    W_out = W * sw
    base = np.zeros((W, W_out), dtype=np.float32)
    cols = np.arange(W_out)
    base[cols // sw, cols] = 1.0
    full = np.tile(base, (1, sh))  # (W, sh*W_out)
    return jnp.asarray(full, dtype=dtype)


def _pick_row_tile(M: int, bytes_per_row: int, budget_bytes: int) -> int:
    """Largest multiple-of-8 divisor of M whose block fits the VMEM budget."""
    cap = max(8, budget_bytes // max(bytes_per_row, 1))
    limit = min(M, cap, 4096)
    start = limit - (limit % 8)
    for cand in range(start, 7, -8):
        if M % cand == 0:
            return cand
    # Small / awkward M: a single full-extent block is always legal.
    return M


def upsample_nearest(x: jnp.ndarray, scale_factor) -> jnp.ndarray:
    """Pallas TPU implementation of nn.Upsample(scale_factor)(x), mode='nearest'.

    x: (N, C, H, W). scale_factor: int or (int, int). Returns (N, C, H*sh, W*sw).
    """
    if isinstance(scale_factor, (tuple, list)):
        sh, sw = int(scale_factor[0]), int(scale_factor[1])
    else:
        sh = sw = int(scale_factor)

    N, C, H, W = x.shape
    H_out, W_out = H * sh, W * sw
    M = N * C * H
    n_cols = sh * W_out  # = sh * sw * W

    # Keep the MXU in the native input dtype where possible (bf16/f32); integer inputs
    # go through f32 (exact for |x| < 2^24).
    if jnp.issubdtype(x.dtype, jnp.floating):
        compute_dtype = x.dtype
    else:
        compute_dtype = jnp.float32
    precision = (
        jax.lax.Precision.HIGHEST if compute_dtype == jnp.float32 else None
    )

    r_mat = _build_replication_matrix(W, sh, sw, compute_dtype)

    x2 = x.reshape(M, W)  # metadata-only reshape
    if x2.dtype != compute_dtype:
        x2 = x2.astype(compute_dtype)

    in_isz = jnp.dtype(compute_dtype).itemsize
    out_isz = jnp.dtype(x.dtype).itemsize
    r_bytes = 2 * W * n_cols * in_isz  # counted double-buffered to be conservative
    budget = 32 * 1024 * 1024 - r_bytes  # keep well under the 64 MiB v7x VMEM
    bytes_per_row = 2 * (W * in_isz + n_cols * out_isz)  # double-buffered in + out
    tm = _pick_row_tile(M, bytes_per_row, max(budget, 8 * bytes_per_row))

    grid = (pl.cdiv(M, tm),)

    kernel = functools.partial(_upsample_matmul_kernel, precision=precision)

    out2 = pl.pallas_call(
        kernel,
        out_shape=jax.ShapeDtypeStruct((M, n_cols), x.dtype),
        grid_spec=pl.GridSpec(
            grid=grid,
            in_specs=[
                pl.BlockSpec((tm, W), lambda i: (i, 0)),
                pl.BlockSpec((W, n_cols), lambda i: (0, 0)),
            ],
            out_specs=pl.BlockSpec((tm, n_cols), lambda i: (i, 0)),
        ),
        compiler_params=pltpu.CompilerParams(
            dimension_semantics=("parallel",),
            vmem_limit_bytes=48 * 1024 * 1024,
        ),
    )(x2, r_mat)

    return out2.reshape(N, C, H_out, W_out)  # metadata-only reshape


def _reference_upsample(x, sh, sw):
    y = jnp.repeat(x, sh, axis=2)
    y = jnp.repeat(y, sw, axis=3)
    return y


if __name__ == "__main__":
    key = jax.random.PRNGKey(0)

    # Primary case: matches the module's typical use (square integer scale).
    N, C, H, W = 2, 4, 16, 16
    scale = 2
    x = jax.random.normal(key, (N, C, H, W), dtype=jnp.float32)

    out = upsample_nearest(x, scale)
    out = jax.block_until_ready(out)

    ref = _reference_upsample(x, scale, scale)
    assert out.shape == (N, C, H * scale, W * scale), out.shape
    assert out.dtype == x.dtype
    np.testing.assert_array_equal(np.asarray(out), np.asarray(ref))

    # Secondary case: asymmetric scale factor.
    key2 = jax.random.PRNGKey(1)
    x2 = jax.random.normal(key2, (1, 3, 8, 16), dtype=jnp.float32)
    out2 = jax.block_until_ready(upsample_nearest(x2, (2, 3)))
    ref2 = _reference_upsample(x2, 2, 3)
    assert out2.shape == (1, 3, 16, 48), out2.shape
    np.testing.assert_array_equal(np.asarray(out2), np.asarray(ref2))

    print("KERNEL_OK")
</pallas_src>

<mosaic_0001>
module attributes {stable_mosaic.version = 11 : i64} {
  func.func @_upsample_matmul_kernel(%arg0: i32, %arg1: memref<128x16xf32, #tpu.memory_space<vmem>>, %arg2: memref<16x64xf32, #tpu.memory_space<vmem>>, %arg3: memref<128x64xf32, #tpu.memory_space<vmem>>) attributes {dimension_semantics = [#tpu.dimension_semantics<parallel>], iteration_bounds = array<i64: 1>, scalar_prefetch = 0 : i64, scratch_operands = 0 : i64, tpu.core_type = #tpu.core_type<tc>, window_params = [{transform_indices = @transform_0, window_bounds = array<i64: 128, 16>}, {pipeline_mode = #tpu.pipeline_mode<synchronous>, transform_indices = @transform_1, window_bounds = array<i64: 16, 64>}, {transform_indices = @transform_2, window_bounds = array<i64: 128, 64>}]} {
    %c0 = arith.constant 0 : index
    %c0_0 = arith.constant 0 : index
    %0 = vector.load %arg1[%c0, %c0_0] : memref<128x16xf32, #tpu.memory_space<vmem>>, vector<128x16xf32>
    %c0_1 = arith.constant 0 : index
    %c0_2 = arith.constant 0 : index
    %1 = vector.load %arg2[%c0_1, %c0_2] : memref<16x64xf32, #tpu.memory_space<vmem>>, vector<16x64xf32>
    %cst = arith.constant dense<0.000000e+00> : vector<128x64xf32>
    %2 = tpu.matmul %0, %1, %cst {dimension_numbers = #tpu.dot_dimension_numbers<[1], [0], [0], [1], [0, 0, 1, 1], [], []>, precision = #tpu.contract_precision<fp32>} : vector<128x16xf32>, vector<16x64xf32>, vector<128x64xf32> -> vector<128x64xf32>
    %c0_3 = arith.constant 0 : index
    %c0_4 = arith.constant 0 : index
    %3 = vector.load %arg3[%c0_3, %c0_4] : memref<128x64xf32, #tpu.memory_space<vmem>>, vector<128x64xf32>
    tpu.vector_store %arg3[%c0_3, %c0_4], %2 {strides = array<i32>} : memref<128x64xf32, #tpu.memory_space<vmem>>, vector<128x64xf32>,
    return
  }
  func.func @transform_0(%arg0: i32) -> (i32, i32) {
    %c0_i32 = arith.constant 0 : i32
    %c0_i32_0 = arith.constant 0 : i32
    return %arg0, %c0_i32 : i32, i32
  }
  func.func @transform_1(%arg0: i32) -> (i32, i32) {
    %c0_i32 = arith.constant 0 : i32
    %c0_i32_0 = arith.constant 0 : i32
    %c0_i32_1 = arith.constant 0 : i32
    return %c0_i32, %c0_i32_0 : i32, i32
  }
  func.func @transform_2(%arg0: i32) -> (i32, i32) {
    %c0_i32 = arith.constant 0 : i32
    %c0_i32_0 = arith.constant 0 : i32
    return %arg0, %c0_i32 : i32, i32
  }
}

</mosaic_0001>

<bundles_post_ra>
// kernel: tpu_custom_call.1
= control target key start
LH: loop header
LB: loop body
LE: loop exit
PB: predicated region body
PF: predicated region fallthrough
CT: control target
= control target key end

     0   :  { %vm29_vm0 = vcmask 130048   ;;  %vm1182_vm1 = vcmask 523264   ;;  %s2023_s1 = inlined_call_operand.vmem [shape: f32[16,64], index: 1, kind: input, shape index: {}]   ;;  %s2024_s0 = inlined_call_operand.vmem [shape: f32[128,16], index: 0, kind: input, shape index: {}]   ;;  %s2025_s2 = inlined_call_operand.vmem [shape: f32[128,64], index: 2, kind: output, shape index: {}]  }
   0x1   :  { %v28_v0 = vld [vmem:[%s2023_s1 + $0x8] sm:$0xff]  ;;  %v27_v1 = vld [vmem:[%s2023_s1] sm:$0xff]  ;;  %v13_v7 = vld [vmem:[%s2024_s0 + $0x10] sm:$0xff] }
   0x2   :  { %v11_v2 = vld [vmem:[%s2024_s0] sm:$0xff]  ;;  %v1503_v3 = vand.u32 4294901760, %v28_v0  ;;  %v1505_v4 = vand.u32 4294901760, %v27_v1  ;;  %v12_v6 = vld [vmem:[%s2024_s0 + $0x8] sm:$0xff]  ;;  %v14_v8 = vld [vmem:[%s2024_s0 + $0x18] sm:$0xff]  ;;  %v37_v11 = vsel %vm29_vm0, %v13_v7, 0 }
   0x3   :  { %v31_v5 = vsel %vm29_vm0, %v11_v2, 0  ;;  %v34_v10 = vsel %vm29_vm0, %v12_v6, 0  ;;  %v40_v12 = vsel %vm29_vm0, %v14_v8, 0  ;;  %v15_v13 = vld [vmem:[%s2024_s0 + $0x20] sm:$0xff]  ;;  %v16_v14 = vld [vmem:[%s2024_s0 + $0x28] sm:$0xff]  ;;  %v1535_v18 = vand.u32 4294901760, %v37_v11 }
   0x4   :  { %v1517_v9 = vand.u32 4294901760, %v31_v5  ;;  %1311 = vmatprep.subr.mxu0 %v1503_v3  ;;  %v335_v15 = vsub.f32 %v28_v0, %v1503_v3  ;;  %v1530_v16 = vand.u32 4294901760, %v34_v10  ;;  %v1533_v17 = vsub.f32 %v27_v1, %v1505_v4  ;;  %v17_v39 = vld [vmem:[%s2024_s0 + $0x30] sm:$0xff]  ;;  %v18_v40 = vld [vmem:[%s2024_s0 + $0x38] sm:$0xff]  ;;  %v19_v49 = vld [vmem:[%s2024_s0 + $0x40] sm:$0xff] }
   0x5   :  { %1312 = vmatpush3.msra.mxu0 %v1503_v3  ;;  %v1542_v20 = vand.u32 4294901760, %v40_v12  ;;  %v43_v21 = vsel %vm29_vm0, %v15_v13, 0  ;;  %v46_v22 = vsel %vm29_vm0, %v16_v14, 0  ;;  %v1556_v26 = vsub.f32 %v37_v11, %v1535_v18  ;;  %v20_v50 = vld [vmem:[%s2024_s0 + $0x48] sm:$0xff]  ;;  %v21_v51 = vld [vmem:[%s2024_s0 + $0x50] sm:$0xff]  ;;  %v22_v60 = vld [vmem:[%s2024_s0 + $0x58] sm:$0xff] }
   0x6   :  { %v1539_v19 = vsub.f32 %v31_v5, %v1517_v9  ;;  %1343 = vmatprep.mubr.f32.mxu1 %v1517_v9  ;;  %1313 = vmatprep.subr.mxu0 %v1505_v4  ;;  %v1547_v23 = vand.u32 4294901760, %v335_v15  ;;  %v1550_v24 = vsub.f32 %v34_v10, %v1530_v16  ;;  %v1553_v25 = vand.u32 4294901760, %v1533_v17  ;;  %v23_v1 = vld [vmem:[%s2024_s0 + $0x60] sm:$0xff]  ;;  %v24_v13 = vld [vmem:[%s2024_s0 + $0x68] sm:$0xff] }
   0x7   :  { %1314 = vmatpush3.msra.mxu0 %v1505_v4  ;;  %v1561_v28 = vsub.f32 %v40_v12, %v1542_v20  ;;  %v1563_v29 = vand.u32 4294901760, %v43_v21  ;;  %v1565_v30 = vand.u32 4294901760, %v46_v22  ;;  %v167_v34 = vand.u32 4294901760, %v1556_v26 }
   0x8   :  { %v147_v27 = vand.u32 4294901760, %v1539_v19  ;;  %v337_v31 = vsub.f32 %v335_v15, %v1547_v23  ;;  %v157_v32 = vand.u32 4294901760, %v1550_v24  ;;  %v344_v33 = vsub.f32 %v1533_v17, %v1553_v25  ;;  %1367 = vmatprep.subr.mxu0 %v335_v15 }
   0x9   :  { %v177_v36 = vand.u32 4294901760, %v1561_v28  ;;  %v1577_v37 = vsub.f32 %v43_v21, %v1563_v29  ;;  %v1580_v38 = vsub.f32 %v46_v22, %v1565_v30  ;;  %v168_v44 = vsub.f32 %v1556_v26, %v167_v34 }
   0xa   :  { %v148_v35 = vsub.f32 %v1539_v19, %v147_v27  ;;  %v338_v41 = vand.u32 4294901760, %v337_v31  ;;  %v158_v42 = vsub.f32 %v1550_v24, %v157_v32  ;;  %v345_v43 = vand.u32 4294901760, %v344_v33 }
   0xb   :  { %v178_v46 = vsub.f32 %v1561_v28, %v177_v36  ;;  %v187_v47 = vand.u32 4294901760, %v1577_v37  ;;  %v197_v48 = vand.u32 4294901760, %v1580_v38  ;;  %v169_v53 = vand.u32 4294901760, %v168_v44 }
   0xc   :  { %v149_v45 = vand.u32 4294901760, %v148_v35  ;;  %1339 = vmatprep.subr.mxu1 %v338_v41  ;;  %v159_v52 = vand.u32 4294901760, %v158_v42  ;;  %v49_v54 = vsel %vm29_vm0, %v17_v39, 0  ;;  %v52_v55 = vsel %vm29_vm0, %v18_v40, 0 }
   0xd   :  { %1340 = vmatpush3.msra.mxu1 %v338_v41  ;;  %v179_v56 = vand.u32 4294901760, %v178_v46  ;;  %v188_v57 = vsub.f32 %v1577_v37, %v187_v47  ;;  %v198_v58 = vsub.f32 %v1580_v38, %v197_v48  ;;  %v1616_v59 = vand.u32 4294901760, %v49_v54 }
   0xe   :  { %1315 = vmatprep.mubr.f32.mxu0 %v149_v45  ;;  %1341 = vmatprep.subr.mxu1 %v345_v43  ;;  %v1621_v61 = vand.u32 4294901760, %v52_v55  ;;  %v55_v62 = vsel %vm29_vm0, %v19_v49, 0  ;;  %v58_v63 = vsel %vm29_vm0, %v20_v50, 0  ;;  %v61_v0 = vsel %vm29_vm0, %v21_v51, 0  ;;  %v25_v50 = vld [vmem:[%s2024_s0 + $0x70] sm:$0xff] }
   0xf   :  { %1316 = vmatmul.mubr.f32.vlgmr.msra.gmra.mxu0 %v159_v52  ;;  %1342 = vmatpush3.msra.mxu1 %v345_v43  ;;  %v189_v2 = vand.u32 4294901760, %v188_v57  ;;  %v199_v5 = vand.u32 4294901760, %v198_v58  ;;  %v1630_v6 = vsub.f32 %v49_v54, %v1616_v59  ;;  %v1632_v7 = vand.u32 4294901760, %v55_v62  ;;  %v26_v57 = vld [vmem:[%s2024_s0 + $0x78] sm:$0xff] }
  0x10   :  { %1368 = vmatpush3.msra.mxu0 %v335_v15  ;;  %1344 = vmatmul.mubr.f32.vlgmr.msra.gmra.mxu1 %v1530_v16  ;;  %v1637_v8 = vsub.f32 %v52_v55, %v1621_v61  ;;  %v1639_v10 = vand.u32 4294901760, %v58_v63  ;;  %v1641_v11 = vand.u32 4294901760, %v61_v0  ;;  %v64_v12 = vsel %vm29_vm0, %v22_v60, 0 }
  0x11   :  { %1395 = vmatprep.subr.mxu1 %v1503_v3  ;;  %1318 = vmatprep.mubr.f32.mxu0 %v169_v53  ;;  %v207_v14 = vand.u32 4294901760, %v1630_v6  ;;  %v1650_v15 = vsub.f32 %v55_v62, %v1632_v7  ;;  %v1652_v21 = vand.u32 4294901760, %v64_v12  ;;  %v67_v22 = vsel %vm29_vm0, %v23_v1, 0 }
  0x12   :  { %1396 = vmatpush3.msra.mxu1 %v1503_v3  ;;  %1346 = vmatprep.mubr.f32.mxu1 %v1535_v18  ;;  %v217_v31 = vand.u32 4294901760, %v1637_v8  ;;  %v1658_v33 = vsub.f32 %v58_v63, %v1639_v10  ;;  %v1661_v35 = vsub.f32 %v61_v0, %v1641_v11  ;;  %v1663_v39 = vand.u32 4294901760, %v67_v22 }
  0x13   :  { %1319 = vmatmul.mubr.f32.gmra.mxu0 %v179_v56  ;;  %v208_v40 = vsub.f32 %v1630_v6, %v207_v14  ;;  %v227_v41 = vand.u32 4294901760, %v1650_v15  ;;  %1369 = vmatprep.subr.mxu0 %v1533_v17  ;;  %v1671_v42 = vsub.f32 %v64_v12, %v1652_v21  ;;  %v70_v43 = vsel %vm29_vm0, %v24_v13, 0 }
  0x14   :  { %1321 = vmatprep.mubr.f32.mxu0 %v189_v2  ;;  %1347 = vmatmul.mubr.f32.gmra.mxu1 %v1542_v20  ;;  %v218_v44 = vsub.f32 %v1637_v8, %v217_v31  ;;  %v237_v45 = vand.u32 4294901760, %v1658_v33  ;;  %v247_v46 = vand.u32 4294901760, %v1661_v35  ;;  %v1682_v49 = vsub.f32 %v67_v22, %v1663_v39 }
  0x15   :  { %1370 = vmatpush3.msra.mxu0 %v1533_v17  ;;  %1349 = vmatprep.mubr.f32.mxu1 %v1563_v29  ;;  %v209_v51 = vand.u32 4294901760, %v208_v40  ;;  %v228_v52 = vsub.f32 %v1650_v15, %v227_v41  ;;  %v257_v17 = vand.u32 4294901760, %v1671_v42  ;;  %v1693_v53 = vand.u32 4294901760, %v70_v43 }
  0x16   :  { %1397 = vmatprep.subr.mxu1 %v1505_v4  ;;  %v219_v54 = vand.u32 4294901760, %v218_v44  ;;  %v238_v55 = vsub.f32 %v1658_v33, %v237_v45  ;;  %v248_v56 = vsub.f32 %v1661_v35, %v247_v46  ;;  %v267_v60 = vand.u32 4294901760, %v1682_v49  ;;  %1423 = vmatprep.subr.mxu0 %v1547_v23 }
  0x17   :  { %1322 = vmatmul.mubr.f32.gmra.mxu0 %v199_v5  ;;  %1398 = vmatpush3.msra.mxu1 %v1505_v4  ;;  %v229_v58 = vand.u32 4294901760, %v228_v52  ;;  %v1707_v62 = vsub.f32 %v70_v43, %v1693_v53  ;;  %v73_v63 = vsel %vm29_vm0, %v25_v50, 0  ;;  %v258_v1 = vsub.f32 %v1671_v42, %v257_v17 }
  0x18   :  { %1324 = vmatprep.mubr.f32.mxu0 %v209_v51  ;;  %1350 = vmatmul.mubr.f32.gmra.mxu1 %v1565_v30  ;;  %v1712_v0 = vand.u32 4294901760, %v73_v63  ;;  %v76_v2 = vsel %vm29_vm0, %v26_v57, 0  ;;  %v239_v5 = vand.u32 4294901760, %v238_v55  ;;  %v249_v40 = vand.u32 4294901760, %v248_v56 }
  0x19   :  { %1451 = vmatprep.subr.mxu1 %v1503_v3  ;;  %1352 = vmatprep.mubr.f32.mxu1 %v1616_v59  ;;  %v277_v12 = vand.u32 4294901760, %v1707_v62  ;;  %v1724_v22 = vand.u32 4294901760, %v76_v2  ;;  %v268_v43 = vsub.f32 %v1682_v49, %v267_v60  ;;  %v259_v51 = vand.u32 4294901760, %v258_v1 }
  0x1a   :  { %v1722_v13 = vsub.f32 %v73_v63, %v1712_v0 }
  0x1b   :  { %1325 = vmatmul.mubr.f32.gmra.mxu0 %v219_v54  ;;  %v1732_v50 = vsub.f32 %v76_v2, %v1724_v22  ;;  %v278_v52 = vsub.f32 %v1707_v62, %v277_v12  ;;  %v269_v55 = vand.u32 4294901760, %v268_v43 }
  0x1c   :  { %1327 = vmatprep.mubr.f32.mxu0 %v229_v58  ;;  %1353 = vmatmul.mubr.f32.gmra.mxu1 %v1621_v61  ;;  %v287_v44 = vand.u32 4294901760, %v1722_v13 }
  0x1d   :  { %1355 = vmatprep.mubr.f32.mxu1 %v1632_v7  ;;  %v297_v54 = vand.u32 4294901760, %v1732_v50  ;;  %v279_v57 = vand.u32 4294901760, %v278_v52 }
  0x1e   :  { %v288_v56 = vsub.f32 %v1722_v13, %v287_v44 }
  0x1f   :  { %1328 = vmatmul.mubr.f32.gmra.mxu0 %v239_v5  ;;  %v298_v58 = vsub.f32 %v1732_v50, %v297_v54 }
  0x20   :  { %1330 = vmatprep.mubr.f32.mxu0 %v249_v40  ;;  %1356 = vmatmul.mubr.f32.gmra.mxu1 %v1639_v10  ;;  %v289_v63 = vand.u32 4294901760, %v288_v56 }
  0x21   :  { %1358 = vmatprep.mubr.f32.mxu1 %v1641_v11  ;;  %v299_v1 = vand.u32 4294901760, %v298_v58 }
  0x23   :  { %1331 = vmatmul.mubr.f32.gmra.mxu0 %v259_v51 }
  0x24   :  { %1333 = vmatprep.mubr.f32.mxu0 %v269_v55  ;;  %1359 = vmatmul.mubr.f32.gmra.mxu1 %v1652_v21 }
  0x25   :  { %1361 = vmatprep.mubr.f32.mxu1 %v1663_v39 }
  0x27   :  { %1334 = vmatmul.mubr.f32.gmra.mxu0 %v279_v57 }
  0x28   :  { %1336 = vmatprep.mubr.f32.mxu0 %v289_v63  ;;  %1362 = vmatmul.mubr.f32.gmra.mxu1 %v1693_v53 }
  0x29   :  { %1364 = vmatprep.mubr.f32.mxu1 %v1712_v0 }
  0x2b   :  { %1337 = vmatmul.mubr.f32.gmra.mxu0 %v299_v1 }
  0x2c   :  { %1371 = vmatprep.mubr.f32.mxu0 %v1539_v19  ;;  %1365 = vmatmul.mubr.f32.gmra.mxu1 %v1724_v22 }
  0x2d   :  { %1399 = vmatprep.mubr.f32.mxu1 %v147_v27 }
  0x2f   :  { %1372 = vmatmul.mubr.f32.vlgmr.msra.gmra.mxu0 %v1550_v24 }
  0x30   :  { %1424 = vmatpush3.msra.mxu0 %v1547_v23  ;;  %1374 = vmatprep.mubr.f32.mxu0 %v1556_v26 }
  0x31   :  { %1400 = vmatmul.mubr.f32.vlgmr.msra.gmra.mxu1 %v157_v32  ;;  %1425 = vmatprep.subr.mxu0 %v1553_v25 }
  0x32   :  { %1452 = vmatpush3.msra.mxu1 %v1503_v3  ;;  %1402 = vmatprep.mubr.f32.mxu1 %v167_v34 }
  0x33   :  { %1375 = vmatmul.mubr.f32.gmra.mxu0 %v1561_v28  ;;  %1453 = vmatprep.subr.mxu1 %v1505_v4 }
  0x34   :  { %1377 = vmatprep.mubr.f32.mxu0 %v1577_v37  ;;  %1426 = vmatpush3.msra.mxu0 %v1553_v25 }
  0x35   :  { %1403 = vmatmul.mubr.f32.gmra.mxu1 %v177_v36 }
  0x36   :  { %1405 = vmatprep.mubr.f32.mxu1 %v187_v47  ;;  %1454 = vmatpush3.msra.mxu1 %v1505_v4 }
  0x37   :  { %1378 = vmatmul.mubr.f32.gmra.mxu0 %v1580_v38 }
  0x38   :  { %1380 = vmatprep.mubr.f32.mxu0 %v1630_v6 }
  0x39   :  { %1406 = vmatmul.mubr.f32.gmra.mxu1 %v197_v48 }
  0x3a   :  { %1408 = vmatprep.mubr.f32.mxu1 %v207_v14 }
  0x3b   :  { %1381 = vmatmul.mubr.f32.gmra.mxu0 %v1637_v8 }
  0x3c   :  { %1383 = vmatprep.mubr.f32.mxu0 %v1650_v15 }
  0x3d   :  { %1409 = vmatmul.mubr.f32.gmra.mxu1 %v217_v31 }
  0x3e   :  { %1411 = vmatprep.mubr.f32.mxu1 %v227_v41 }
  0x3f   :  { %1384 = vmatmul.mubr.f32.gmra.mxu0 %v1658_v33 }
  0x40   :  { %1386 = vmatprep.mubr.f32.mxu0 %v1661_v35 }
  0x41   :  { %1412 = vmatmul.mubr.f32.gmra.mxu1 %v237_v45 }
  0x42   :  { %1414 = vmatprep.mubr.f32.mxu1 %v247_v46 }
  0x43   :  { %1387 = vmatmul.mubr.f32.gmra.mxu0 %v1671_v42 }
  0x44   :  { %1389 = vmatprep.mubr.f32.mxu0 %v1682_v49 }
  0x45   :  { %1415 = vmatmul.mubr.f32.gmra.mxu1 %v257_v17 }
  0x46   :  { %1417 = vmatprep.mubr.f32.mxu1 %v267_v60 }
  0x47   :  { %1390 = vmatmul.mubr.f32.gmra.mxu0 %v1707_v62 }
  0x48   :  { %1392 = vmatprep.mubr.f32.mxu0 %v1722_v13 }
  0x49   :  { %1418 = vmatmul.mubr.f32.gmra.mxu1 %v277_v12 }
  0x4a   :  { %1420 = vmatprep.mubr.f32.mxu1 %v287_v44 }
  0x4b   :  { %1393 = vmatmul.mubr.f32.gmra.mxu0 %v1732_v50 }
  0x4c   :  { %1427 = vmatprep.mubr.f32.mxu0 %v1517_v9 }
  0x4d   :  { %1421 = vmatmul.mubr.f32.gmra.mxu1 %v297_v54 }
  0x4e   :  { %1455 = vmatprep.mubr.f32.mxu1 %v1517_v9 }
  0x4f   :  { %1428 = vmatmul.mubr.f32.vlgmr.msra.gmra.mxu0 %v1530_v16 }
  0x50   :  { %1430 = vmatprep.mubr.f32.mxu0 %v1535_v18 }
  0x51   :  { %1456 = vmatmul.mubr.f32.vlgmr.msra.gmra.mxu1 %v1530_v16 }
  0x52   :  { %1458 = vmatprep.mubr.f32.mxu1 %v1535_v18 }
  0x53   :  { %1431 = vmatmul.mubr.f32.gmra.mxu0 %v1542_v20 }
  0x54   :  { %1433 = vmatprep.mubr.f32.mxu0 %v1563_v29 }
  0x55   :  { %1459 = vmatmul.mubr.f32.gmra.mxu1 %v1542_v20 }
  0x56   :  { %1461 = vmatprep.mubr.f32.mxu1 %v1563_v29 }
  0x57   :  { %1434 = vmatmul.mubr.f32.gmra.mxu0 %v1565_v30 }
  0x58   :  { %1436 = vmatprep.mubr.f32.mxu0 %v1616_v59 }
  0x59   :  { %1462 = vmatmul.mubr.f32.gmra.mxu1 %v1565_v30 }
  0x5a   :  { %1464 = vmatprep.mubr.f32.mxu1 %v1616_v59 }
  0x5b   :  { %1437 = vmatmul.mubr.f32.gmra.mxu0 %v1621_v61 }
  0x5c   :  { %1439 = vmatprep.mubr.f32.mxu0 %v1632_v7 }
  0x5d   :  { %1465 = vmatmul.mubr.f32.gmra.mxu1 %v1621_v61 }
  0x5e   :  { %1467 = vmatprep.mubr.f32.mxu1 %v1632_v7 }
  0x5f   :  { %1440 = vmatmul.mubr.f32.gmra.mxu0 %v1639_v10 }
  0x60   :  { %1442 = vmatprep.mubr.f32.mxu0 %v1641_v11 }
  0x61   :  { %1468 = vmatmul.mubr.f32.gmra.mxu1 %v1639_v10 }
  0x62   :  { %1470 = vmatprep.mubr.f32.mxu1 %v1641_v11 }
  0x63   :  { %1443 = vmatmul.mubr.f32.gmra.mxu0 %v1652_v21 }
  0x64   :  { %1445 = vmatprep.mubr.f32.mxu0 %v1663_v39 }
  0x65   :  { %1471 = vmatmul.mubr.f32.gmra.mxu1 %v1652_v21 }
  0x66   :  { %1473 = vmatprep.mubr.f32.mxu1 %v1663_v39 }
  0x67   :  { %1446 = vmatmul.mubr.f32.gmra.mxu0 %v1693_v53 }
  0x68   :  { %1448 = vmatprep.mubr.f32.mxu0 %v1712_v0 }
  0x69   :  { %1474 = vmatmul.mubr.f32.gmra.mxu1 %v1693_v53 }
  0x6a   :  { %1476 = vmatprep.mubr.f32.mxu1 %v1712_v0 }
  0x6b   :  { %1449 = vmatmul.mubr.f32.gmra.mxu0 %v1724_v22 }
  0x6d   :  { %1477 = vmatmul.mubr.f32.gmra.mxu1 %v1724_v22 }
  0xcf   :  { %v1317_v3 = vpop.f32.mrf.mxu0 }
  0xd0   :  { %v1345_v9 = vpop.f32.mrf.mxu1 }
  0xd1   :  { %v151_v4 = vpop.f32.mrf.mxu0  ;;  %v389_v54 = vadd.f32 %v1345_v9, %v1317_v3 }
  0xd2   :  { %v382_v18 = vpop.f32.mrf.mxu1 }
  0xd3   :  { %v1320_v16 = vpop.f32.mrf.mxu0  ;;  %v383_v57 = vadd.f32 %v382_v18, %v151_v4 }
  0xd4   :  { %v1348_v20 = vpop.f32.mrf.mxu1 }
  0xd5   :  { %v1830_v19 = vpop.f32.mrf.mxu0 }
  0xd6   :  { %v394_v24 = vpop.f32.mrf.mxu1 }
  0xd7   :  { %v1832_v23 = vpop.f32.mrf.mxu0 }
  0xd8   :  { %v1836_v26 = vpop.f32.mrf.mxu1 }
  0xd9   :  { %v1834_v25 = vpop.f32.mrf.mxu0  ;;  %v413_v4 = vadd.f32 %v1836_v26, %v1832_v23 }
  0xda   :  { %v1840_v28 = vpop.f32.mrf.mxu1 }
  0xdb   :  { %v1838_v27 = vpop.f32.mrf.mxu0 }
  0xdc   :  { %v1844_v30 = vpop.f32.mrf.mxu1 }
  0xdd   :  { %v1842_v29 = vpop.f32.mrf.mxu0 }
  0xde   :  { %v1848_v34 = vpop.f32.mrf.mxu1 }
  0xdf   :  { %v1846_v32 = vpop.f32.mrf.mxu0 }
  0xe0   :  { %v1852_v37 = vpop.f32.mrf.mxu1 }
  0xe1   :  { %v1850_v36 = vpop.f32.mrf.mxu0 }
  0xe2   :  { %v1856_v47 = vpop.f32.mrf.mxu1 }
  0xe3   :  { %v1854_v38 = vpop.f32.mrf.mxu0 }
  0xe4   :  { %v1860_v59 = vpop.f32.mrf.mxu1 }
  0xe5   :  { %v1858_v48 = vpop.f32.mrf.mxu0 }
  0xe6   :  { %v1864_v6 = vpop.f32.mrf.mxu1 }
  0xe7   :  { %v1862_v61 = vpop.f32.mrf.mxu0 }
  0xe8   :  { %v1868_v8 = vpop.f32.mrf.mxu1 }
  0xe9   :  { %v1866_v7 = vpop.f32.mrf.mxu0 }
  0xea   :  { %v1872_v11 = vpop.f32.mrf.mxu1 }
  0xeb   :  { %v1870_v10 = vpop.f32.mrf.mxu0 }
  0xec   :  { %2026 = vst [vmem:[#allocation2_spill] sm:$0xff] %v1870_v10  ;;  %v1876_v15 = vpop.f32.mrf.mxu1 }
  0xed   :  { %v1874_v14 = vpop.f32.mrf.mxu0  ;;  %2028 = vst [vmem:[#allocation4_spill] sm:$0xff] %v1876_v15 }
  0xee   :  { %2027 = vst [vmem:[#allocation3_spill] sm:$0xff] %v1874_v14  ;;  %v1878_v21 = vpop.f32.mrf.mxu1 }
  0xef   :  { %2029 = vst [vmem:[#allocation5_spill] sm:$0xff] %v1878_v21  ;;  %v1373_v31 = vpop.f32.mrf.mxu0  ;;  %v401_v21 = vadd.f32 %v1348_v20, %v1320_v16  ;;  %v407_v16 = vadd.f32 %v1840_v28, %v1834_v25  ;;  %v419_v28 = vadd.f32 %v1848_v34, %v1842_v29 }
  0xf0   :  { %v556_v58 = vadd.f32 %v1373_v31, %v389_v54 }
  0xf1   :  { %v548_v33 = vpop.f32.mrf.mxu0  ;;  %v1401_v35 = vpop.f32.mrf.mxu1 }
  0xf2   :  { %v549_v14 = vadd.f32 %v548_v33, %v383_v57 }
  0xf3   :  { %v1376_v39 = vpop.f32.mrf.mxu0  ;;  %v728_v41 = vpop.f32.mrf.mxu1 }
  0xf4   :  { %v570_v3 = vadd.f32 %v1376_v39, %v401_v21  ;;  %v729_v18 = vadd.f32 %v728_v41, %v549_v14  ;;  %v425_v21 = vadd.f32 %v1844_v30, %v1838_v27 }
  0xf5   :  { %v562_v42 = vpop.f32.mrf.mxu0  ;;  %v1404_v45 = vpop.f32.mrf.mxu1 }
  0xf6   :  { %v753_v57 = vadd.f32 %v1404_v45, %v570_v3 }
  0xf7   :  { %v1379_v46 = vpop.f32.mrf.mxu0  ;;  %v744_v49 = vpop.f32.mrf.mxu1 }
  0xf9   :  { %v576_v17 = vpop.f32.mrf.mxu0  ;;  %v1407_v53 = vpop.f32.mrf.mxu1 }
  0xfa   :  { %v577_v23 = vadd.f32 %v576_v17, %v407_v16  ;;  %v461_v16 = vadd.f32 %v1868_v8, %v1862_v61 }
  0xfb   :  { %v1382_v60 = vpop.f32.mrf.mxu0  ;;  %v760_v62 = vpop.f32.mrf.mxu1 }
  0xfc   :  { %v598_v45 = vadd.f32 %v1382_v60, %v425_v21 }
  0xfd   :  { %v590_v0 = vpop.f32.mrf.mxu0  ;;  %v1880_v2 = vpop.f32.mrf.mxu1 }
  0xff   :  { %v1882_v5 = vpop.f32.mrf.mxu0  ;;  %v1884_v12 = vpop.f32.mrf.mxu1 }
 0x101   :  { %v1886_v13 = vpop.f32.mrf.mxu0  ;;  %v1888_v22 = vpop.f32.mrf.mxu1 }
 0x103   :  { %v1890_v40 = vpop.f32.mrf.mxu0  ;;  %v1892_v43 = vpop.f32.mrf.mxu1 }
 0x105   :  { %v1894_v44 = vpop.f32.mrf.mxu0  ;;  %v1896_v50 = vpop.f32.mrf.mxu1 }
 0x107   :  { %v1898_v51 = vpop.f32.mrf.mxu0  ;;  %v1900_v52 = vpop.f32.mrf.mxu1 }
 0x108   :  { %2030 = vst [vmem:[#allocation6_spill] sm:$0xff] %v1898_v51  ;;  %2031 = vst [vmem:[#allocation7_spill] sm:$0xff] %v1900_v52  ;;  %v395_v51 = vadd.f32 %v394_v24, %v1830_v19  ;;  %v737_v52 = vadd.f32 %v1401_v35, %v556_v58 }
 0x109   :  { %v1902_v55 = vpop.f32.mrf.mxu0  ;;  %v1904_v56 = vpop.f32.mrf.mxu1 }
 0x10a   :  { %2032 = vst [vmem:[#allocation8_spill] sm:$0xff] %v1902_v55  ;;  %v563_v31 = vadd.f32 %v562_v42, %v395_v51  ;;  %v761_v51 = vadd.f32 %v760_v62, %v577_v23 }
 0x10b   :  { %v1906_v63 = vpop.f32.mrf.mxu0  ;;  %v1908_v1 = vpop.f32.mrf.mxu1 }
 0x10c   :  { %v745_v58 = vadd.f32 %v744_v49, %v563_v31 }
 0x10d   :  { %v1910_v15 = vpop.f32.mrf.mxu0  ;;  %v1912_v10 = vpop.f32.mrf.mxu1 }
 0x10e   :  { %2033 = vst [vmem:[#allocation9_spill] sm:$0xff] %v1912_v10  ;;  %v584_v10 = vadd.f32 %v1379_v46, %v413_v4  ;;  %v437_v46 = vadd.f32 %v1852_v37, %v1846_v32 }
 0x10f   :  { %v1915_v9 = vpop.f32.mrf.mxu1  ;;  %v1429_v55 = vpop.f32.mrf.mxu0  ;;  %v2034_v8 = vld [vmem:[#allocation6_spill] sm:$0xff] }
 0x110   :  { %v932_v54 = vadd.f32 %v1429_v55, %v737_v52  ;;  %v769_v42 = vadd.f32 %v1407_v53, %v584_v10  ;;  %v591_v52 = vadd.f32 %v590_v0, %v419_v28  ;;  %v431_v10 = vadd.f32 %v1856_v47, %v1850_v36 }
 0x111   :  { %v925_v20 = vpop.f32.mrf.mxu0  ;;  %v1457_v33 = vpop.f32.mrf.mxu1  ;;  %v785_v55 = vadd.f32 %v1880_v2, %v598_v45  ;;  %v612_v32 = vadd.f32 %v1882_v5, %v437_v46  ;;  %v449_v0 = vadd.f32 %v1860_v59, %v1854_v38  ;;  %v640_v21 = vadd.f32 %v2034_v8, %v461_v16 }
 0x112   :  { %v926_v19 = vadd.f32 %v925_v20, %v729_v18  ;;  %v1095_v24 = vadd.f32 %v1457_v33, %v932_v54  ;;  %v777_v36 = vadd.f32 %v1884_v12, %v591_v52  ;;  %v605_v47 = vadd.f32 %v1886_v13, %v431_v10 }
 0x113   :  { %v1432_v35 = vpop.f32.mrf.mxu0  ;;  %v1088_v39 = vpop.f32.mrf.mxu1  ;;  %v443_v18 = vadd.f32 %v1864_v6, %v1858_v48  ;;  %v801_v38 = vadd.f32 %v1888_v22, %v612_v32  ;;  %v626_v59 = vadd.f32 %v1890_v40, %v449_v0  ;;  %v833_v46 = vadd.f32 %v1904_v56, %v640_v21 }
 0x114   :  { %1184 = vst.msk [vmem:[%s2025_s2 + $0x8] sm:$0xff] %vm1182_vm1, %v1095_v24  ;;  %v944_v25 = vadd.f32 %v1432_v35, %v753_v57  ;;  %v1089_v26 = vadd.f32 %v1088_v39, %v926_v19  ;;  %v793_v48 = vadd.f32 %v1892_v43, %v605_v47  ;;  %v455_v57 = vadd.f32 %v1872_v11, %v1866_v7  ;;  %v2035_v35 = vld [vmem:[#allocation2_spill] sm:$0xff]  ;;  %v2036_v39 = vld [vmem:[#allocation4_spill] sm:$0xff] }
 0x115   :  { %v937_v14 = vpop.f32.mrf.mxu0  ;;  %v1460_v41 = vpop.f32.mrf.mxu1  ;;  %v619_v6 = vadd.f32 %v1894_v44, %v443_v18  ;;  %v817_v61 = vadd.f32 %v1896_v50, %v626_v59  ;;  %v2038_v11 = vld [vmem:[#allocation8_spill] sm:$0xff] }
 0x116   :  { %1183 = vst.msk [vmem:[%s2025_s2] sm:$0xff] %vm1182_vm1, %v1089_v26  ;;  %v938_v27 = vadd.f32 %v937_v14, %v745_v58  ;;  %v1107_v30 = vadd.f32 %v1460_v41, %v944_v25  ;;  %v473_v58 = vadd.f32 %v2036_v39, %v2035_v35  ;;  %v2037_v26 = vld [vmem:[#allocation7_spill] sm:$0xff]  ;;  %v633_v28 = vadd.f32 %v2038_v11, %v455_v57 }
 0x117   :  { %v1435_v49 = vpop.f32.mrf.mxu0  ;;  %v1100_v17 = vpop.f32.mrf.mxu1  ;;  %v809_v7 = vadd.f32 %v2037_v26, %v619_v6  ;;  %v2039_v41 = vld [vmem:[#allocation3_spill] sm:$0xff] }
 0x118   :  { %1186 = vst.msk [vmem:[%s2025_s2 + $0x18] sm:$0xff] %vm1182_vm1, %v1107_v30  ;;  %v956_v29 = vadd.f32 %v1435_v49, %v769_v42  ;;  %v1101_v34 = vadd.f32 %v1100_v17, %v938_v27  ;;  %v2040_v42 = vld [vmem:[#allocation5_spill] sm:$0xff]  ;;  %v654_v49 = vadd.f32 %v1906_v63, %v473_v58 }
 0x119   :  { %v949_v53 = vpop.f32.mrf.mxu0  ;;  %v1463_v60 = vpop.f32.mrf.mxu1  ;;  %v467_v45 = vadd.f32 %v2040_v42, %v2039_v41 }
 0x11a   :  { %1185 = vst.msk [vmem:[%s2025_s2 + $0x10] sm:$0xff] %vm1182_vm1, %v1101_v34  ;;  %v950_v37 = vadd.f32 %v949_v53, %v761_v51  ;;  %v1119_v62 = vadd.f32 %v1463_v60, %v956_v29  ;;  %v825_v34 = vadd.f32 %v1908_v1, %v633_v28 }
 0x11b   :  { %v1438_v3 = vpop.f32.mrf.mxu0  ;;  %v1112_v4 = vpop.f32.mrf.mxu1  ;;  %v647_v10 = vadd.f32 %v1910_v15, %v467_v45 }
 0x11c   :  { %1188 = vst.msk [vmem:[%s2025_s2 + $0x28] sm:$0xff] %vm1182_vm1, %v1119_v62  ;;  %v968_v2 = vadd.f32 %v1438_v3, %v785_v55  ;;  %v1113_v5 = vadd.f32 %v1112_v4, %v950_v37  ;;  %v2041_v55 = vld [vmem:[#allocation9_spill] sm:$0xff] }
 0x11d   :  { %v961_v31 = vpop.f32.mrf.mxu0  ;;  %v1466_v54 = vpop.f32.mrf.mxu1  ;;  %v849_v32 = vadd.f32 %v2041_v55, %v654_v49  ;;  %v841_v0 = vadd.f32 %v1915_v9, %v647_v10 }
 0x11e   :  { %1187 = vst.msk [vmem:[%s2025_s2 + $0x20] sm:$0xff] %vm1182_vm1, %v1113_v5  ;;  %v962_v12 = vadd.f32 %v961_v31, %v777_v36  ;;  %v1131_v13 = vadd.f32 %v1466_v54, %v968_v2 }
 0x11f   :  { %v1441_v20 = vpop.f32.mrf.mxu0  ;;  %v1124_v33 = vpop.f32.mrf.mxu1 }
 0x120   :  { %1190 = vst.msk [vmem:[%s2025_s2 + $0x38] sm:$0xff] %vm1182_vm1, %v1131_v13  ;;  %v980_v22 = vadd.f32 %v1441_v20, %v801_v38  ;;  %v1125_v40 = vadd.f32 %v1124_v33, %v962_v12 }
 0x121   :  { %v973_v19 = vpop.f32.mrf.mxu0  ;;  %v1469_v24 = vpop.f32.mrf.mxu1 }
 0x122   :  { %1189 = vst.msk [vmem:[%s2025_s2 + $0x30] sm:$0xff] %vm1182_vm1, %v1125_v40  ;;  %v974_v43 = vadd.f32 %v973_v19, %v793_v48  ;;  %v1143_v44 = vadd.f32 %v1469_v24, %v980_v22 }
 0x123   :  { %v1444_v23 = vpop.f32.mrf.mxu0  ;;  %v1136_v25 = vpop.f32.mrf.mxu1 }
 0x124   :  { %1192 = vst.msk [vmem:[%s2025_s2 + $0x48] sm:$0xff] %vm1182_vm1, %v1143_v44  ;;  %v992_v50 = vadd.f32 %v1444_v23, %v817_v61  ;;  %v1137_v14 = vadd.f32 %v1136_v25, %v974_v43 }
 0x125   :  { %v985_v27 = vpop.f32.mrf.mxu0  ;;  %v1472_v30 = vpop.f32.mrf.mxu1 }
 0x126   :  { %1191 = vst.msk [vmem:[%s2025_s2 + $0x40] sm:$0xff] %vm1182_vm1, %v1137_v14  ;;  %v986_v17 = vadd.f32 %v985_v27, %v809_v7  ;;  %v1155_v51 = vadd.f32 %v1472_v30, %v992_v50 }
 0x127   :  { %v1447_v52 = vpop.f32.mrf.mxu0  ;;  %v1148_v29 = vpop.f32.mrf.mxu1 }
 0x128   :  { %1194 = vst.msk [vmem:[%s2025_s2 + $0x58] sm:$0xff] %vm1182_vm1, %v1155_v51  ;;  %v1004_v56 = vadd.f32 %v1447_v52, %v833_v46  ;;  %v1149_v63 = vadd.f32 %v1148_v29, %v986_v17 }
 0x129   :  { %v997_v53 = vpop.f32.mrf.mxu0  ;;  %v1475_v60 = vpop.f32.mrf.mxu1 }
 0x12a   :  { %1193 = vst.msk [vmem:[%s2025_s2 + $0x50] sm:$0xff] %vm1182_vm1, %v1149_v63  ;;  %v998_v37 = vadd.f32 %v997_v53, %v825_v34  ;;  %v1167_v1 = vadd.f32 %v1475_v60, %v1004_v56 }
 0x12b   :  { %v1450_v62 = vpop.f32.mrf.mxu0  ;;  %v1160_v15 = vpop.f32.mrf.mxu1 }
 0x12c   :  { %1196 = vst.msk [vmem:[%s2025_s2 + $0x68] sm:$0xff] %vm1182_vm1, %v1167_v1  ;;  %v1016_v3 = vadd.f32 %v1450_v62, %v849_v32  ;;  %v1161_v4 = vadd.f32 %v1160_v15, %v998_v37 }
 0x12d   :  { %v1009_v36 = vpop.f32.mrf.mxu0  ;;  %v1478_v47 = vpop.f32.mrf.mxu1 }
 0x12e   :  { %1195 = vst.msk [vmem:[%s2025_s2 + $0x60] sm:$0xff] %vm1182_vm1, %v1161_v4  ;;  %v1010_v2 = vadd.f32 %v1009_v36, %v841_v0  ;;  %v1179_v5 = vadd.f32 %v1478_v47, %v1016_v3 }
 0x12f   :  { %v1172_v18 = vpop.f32.mrf.mxu1 }
 0x130   :  { %1198 = vst.msk [vmem:[%s2025_s2 + $0x78] sm:$0xff] %vm1182_vm1, %v1179_v5  ;;  %v1173_v9 = vadd.f32 %v1172_v18, %v1010_v2 }
 0x132   :  { %1197 = vst.msk [vmem:[%s2025_s2 + $0x70] sm:$0xff] %vm1182_vm1, %v1173_v9 }

</bundles_post_ra>
